<compile_context>
chip_gen: v5e
topology: v5e:2x2
jax: 0.10.0
libtpu: 0.0.40
codegen_flags: <defaults>
</compile_context>

<pallas_src>
import functools

import numpy as np
import jax
import jax.numpy as jnp
from jax.experimental import pallas as pl
from jax.experimental.pallas import tpu as pltpu

# ----- deterministic stand-ins for parameters.my_parameters() -----------------
IMG_SIZE = 32            # args.img_size
WAVE_LENGTH = 5.32e-7    # actual_situation.wave_length
SCREEN_LENGTH = 0.004    # actual_situation.screen_length
DISTANCE = 0.05          # actual_situation.distance
WAVE_NUM = 2 * 3.14159 / WAVE_LENGTH

BLK = 128                # output lanes per grid step (weight tile = [NN, 2*BLK] = 512 KiB bf16)


def build_H(N):
    """Transfer function H of DiffractiveLayer (already fftshifted), complex64 [N,N]."""
    dx = SCREEN_LENGTH / N
    fx = np.arange(-1.0 / (2 * dx), 1.0 / (2 * dx), 1.0 / SCREEN_LENGTH)[:N]
    phi = np.fromfunction(
        lambda i, j: 1 - (np.square(WAVE_LENGTH * fx[i]) + np.square(WAVE_LENGTH * fx[j])),
        shape=(N, N), dtype=np.int16).astype(np.complex64)
    H = np.exp(1j * WAVE_NUM * DISTANCE * np.sqrt(phi))
    return np.fft.fftshift(H, axes=(0, 1)).astype(np.complex64)


@functools.lru_cache(maxsize=None)
def build_operator(N, blk):
    """Fused diffraction operator, built once per (N, blk) and cached on device.

    With row-major vec():  vec(A X A^T) = (A⊗A) vec(X), so
      Z = B (H ⊙ (A X A^T)) B^T   <=>   vec(Z) = M vec(X),
      M = (B⊗B) · diag(vec(H)) · (A⊗A)        (N^2 x N^2 complex).
    The kernel computes row-vector products  vec(X) @ M^T.  Re(M)^T and Im(M)^T are
    interleaved per `blk`-wide column block into ONE bf16 array [NN, 2*NN] so each
    grid step streams a single contiguous [NN, 2*blk] weight tile and does one MXU dot.
    """
    Hs = build_H(N)
    n = np.arange(N)
    F = np.exp(-2j * np.pi * np.outer(n, n) / N).astype(np.complex64)   # forward DFT
    G = (np.conj(F) / N).astype(np.complex64)                           # inverse DFT
    Sf = np.fft.fftshift(np.eye(N, dtype=np.float32), axes=0)           # fftshift permutation
    Si = np.fft.ifftshift(np.eye(N, dtype=np.float32), axes=0)          # ifftshift permutation
    A = (F @ Sf).astype(np.complex64)        # fft2(fftshift(X))   == A @ X @ A.T
    B = (Si @ G).astype(np.complex64)        # ifftshift(ifft2(K)) == B @ K @ B.T
    A2 = np.kron(A, A)
    B2 = np.kron(B, B)
    M = (B2 * Hs.reshape(-1)[None, :]) @ A2                              # [NN, NN] complex64

    NN = N * N
    nb = NN // blk
    MrT = np.ascontiguousarray(M.real.T)     # [NN, NN]
    MiT = np.ascontiguousarray(M.imag.T)     # [NN, NN]
    # Column-block interleave: block j -> [ MrT[:, j*blk:(j+1)*blk] | MiT[:, j*blk:(j+1)*blk] ]
    W = np.stack([MrT.reshape(NN, nb, blk), MiT.reshape(NN, nb, blk)],
                 axis=2).reshape(NN, 2 * NN)
    # TODO(synk): int8 (v5e/v6e) or fp8-e4m3 (v7x) weight quantization with per-column
    # scales would halve the dominant HBM stream but risks the 5e-2 accuracy check.
    return jnp.asarray(W, jnp.bfloat16)


def quantize_dequantize(x, num_bits=8):
    # TODO(synk): utils.quantize_tensor/dequantize_tensor source is not provided;
    # emulate with a standard 8-bit affine quantize -> dequantize round trip.
    qmin, qmax = 0.0, 2.0 ** num_bits - 1.0
    min_val, max_val = x.min(), x.max()
    scale = (max_val - min_val) / (qmax - qmin)
    scale = jnp.maximum(scale, jnp.float32(1e-12))   # guard constant tensors (avoid NaN/Inf)
    zero_point = jnp.clip(jnp.round(qmin - min_val / scale), qmin, qmax)
    q = jnp.clip(jnp.round(x / scale + zero_point), qmin, qmax)
    return scale * (q - zero_point)


# ------------------------------ Pallas kernel ---------------------------------
def net_kernel(x_ref, w_ref, o_ref):
    """One output-lane tile of the fused diffraction.

    x_ref: [8, NN]      bf16, resident across the grid (constant index_map):
                        rows 0:4 = Re of the 4 Jones fields (l0,l1,r0,r1), rows 4:8 = Im.
    w_ref: [NN, 2*blk]  bf16 weight tile: cols [0:blk] = Re(M)^T, cols [blk:2*blk] = Im(M)^T.
    o_ref: [8, blk]     f32 output tile: rows 0:4 = Re(Z), rows 4:8 = Im(Z).
    """
    blk = o_ref.shape[1]
    r = jnp.dot(x_ref[...], w_ref[...], preferred_element_type=jnp.float32)  # [8, 2*blk]
    re_z = r[0:4, 0:blk] - r[4:8, blk:]      # Re(Z) = Xr Mr^T - Xi Mi^T
    im_z = r[0:4, blk:] + r[4:8, 0:blk]      # Im(Z) = Xr Mi^T + Xi Mr^T
    o_ref[...] = jnp.concatenate([re_z, im_z], axis=0)   # one unmasked lane-dense store


@jax.jit
def _net_forward_jit(alpha1, alpha2, delta2, W):
    N = alpha1.shape[0]
    NN = N * N
    nb = NN // BLK

    # TransmissionLayer: tiny elementwise prologue, fused by XLA with the quantize
    # stand-in.  Kept out of the gridded kernel so it is computed exactly once —
    # not once per grid step — and has no per-core scratch-init hazard under the
    # "parallel" 2-TC split on v7x.
    d2 = quantize_dequantize(delta2)
    cos_d, sin_d = jnp.cos(d2 * 0.5), jnp.sin(d2 * 0.5)
    cos_a1, sin_a1 = jnp.cos(alpha1), jnp.sin(alpha1)
    cos_sub, sin_sub = jnp.cos(alpha1 - alpha2), jnp.sin(alpha1 - alpha2)
    x8 = jnp.stack([
        (-cos_sub * sin_d).reshape(NN),   # Re left[0]
        (-sin_sub * sin_d).reshape(NN),   # Re left[1]
        (sin_sub * sin_d).reshape(NN),    # Re right[0]
        (-cos_sub * sin_d).reshape(NN),   # Re right[1]
        (-cos_a1 * cos_d).reshape(NN),    # Im left[0]
        (sin_a1 * cos_d).reshape(NN),     # Im left[1]
        (sin_a1 * cos_d).reshape(NN),     # Im right[0]
        (cos_a1 * cos_d).reshape(NN),     # Im right[1]
    ], axis=0).astype(jnp.bfloat16)       # [8, NN] lane-dense field slab

    out = pl.pallas_call(
        net_kernel,
        out_shape=jax.ShapeDtypeStruct((8, NN), jnp.float32),
        grid_spec=pltpu.PrefetchScalarGridSpec(
            num_scalar_prefetch=0,
            grid=(nb,),
            in_specs=[
                # Fields: same block every step -> stays resident in VMEM, no re-DMA.
                pl.BlockSpec((8, NN), lambda j: (0, 0)),
                # Weights: streamed per output-lane block, double-buffered by Pallas.
                # If profiling shows exposed weight DMA, add pipeline_mode=pl.Buffered(3)
                # here and/or sweep BLK (128 vs 256).
                pl.BlockSpec((NN, 2 * BLK), lambda j: (0, j)),
            ],
            out_specs=pl.BlockSpec((8, BLK), lambda j: (0, j)),
        ),
        compiler_params=pltpu.CompilerParams(
            dimension_semantics=("parallel",)),    # v7x: shard lane axis over 2 TCs
    )(x8, W)

    left = (out[0:2] + 1j * out[4:6]).astype(jnp.complex64).reshape(2, N, N)
    right = (out[2:4] + 1j * out[6:8]).astype(jnp.complex64).reshape(2, N, N)
    return left, right


def net_forward(x, alpha1, alpha2, delta2):
    """Pallas implementation of Net.forward. x: complex64 [2,N,N] (shape-only use)."""
    N = alpha1.shape[0]
    assert x.shape == (2, N, N)
    W = build_operator(N, BLK)          # cached: built + uploaded once per N
    return _net_forward_jit(alpha1, alpha2, delta2, W)


# ------------------------- pure-JAX reference (FFT) ----------------------------
def reference_forward(alpha1, alpha2, delta2, Hc):
    d2 = quantize_dequantize(delta2)
    cos_d, sin_d = jnp.cos(d2 / 2), jnp.sin(d2 / 2)
    cos_a1, sin_a1 = jnp.cos(alpha1), jnp.sin(alpha1)
    cos_sub, sin_sub = jnp.cos(alpha1 - alpha2), jnp.sin(alpha1 - alpha2)
    left = jnp.stack([(-cos_sub * sin_d) + 1j * (-cos_a1 * cos_d),
                      (-sin_sub * sin_d) + 1j * (sin_a1 * cos_d)], 0).astype(jnp.complex64)
    right = jnp.stack([(sin_sub * sin_d) + 1j * (sin_a1 * cos_d),
                       (-cos_sub * sin_d) + 1j * (cos_a1 * cos_d)], 0).astype(jnp.complex64)

    def dif(w):
        t = jnp.fft.fft2(jnp.fft.fftshift(w, axes=(1, 2)), axes=(1, 2))
        return jnp.fft.ifftshift(jnp.fft.ifft2(t * Hc[None], axes=(1, 2)), axes=(1, 2))

    return dif(left), dif(right)


if __name__ == "__main__":
    N = IMG_SIZE
    key = jax.random.PRNGKey(0)
    k1, k2, k3, k4, k5 = jax.random.split(key, 5)

    # Deterministic "parameters" (TransmissionLayer init: 2*pi*U[0,1))
    alpha1 = 2 * np.pi * jax.random.uniform(k1, (N, N), jnp.float32)
    alpha2 = 2 * np.pi * jax.random.uniform(k2, (N, N), jnp.float32)
    delta2 = 2 * np.pi * jax.random.uniform(k3, (N, N), jnp.float32)

    # Example input wave (complex64 [2, N, N]); only its shape matters to the forward.
    x = (jax.random.normal(k4, (2, N, N), jnp.float32)
         + 1j * jax.random.normal(k5, (2, N, N), jnp.float32)).astype(jnp.complex64)

    left, right = net_forward(x, alpha1, alpha2, delta2)
    jax.block_until_ready((left, right))

    ref_l, ref_r = reference_forward(alpha1, alpha2, delta2, jnp.asarray(build_H(N)))
    err = max(
        float(jnp.max(jnp.abs(jnp.real(left) - jnp.real(ref_l)))),
        float(jnp.max(jnp.abs(jnp.imag(left) - jnp.imag(ref_l)))),
        float(jnp.max(jnp.abs(jnp.real(right) - jnp.real(ref_r)))),
        float(jnp.max(jnp.abs(jnp.imag(right) - jnp.imag(ref_r)))),
    )
    assert err < 5e-2, f"mismatch vs FFT reference: max abs err = {err}"
    print("KERNEL_OK")
</pallas_src>

<mosaic_0001>
module attributes {stable_mosaic.version = 11 : i64} {
  func.func @net_kernel(%arg0: i32, %arg1: memref<8x1024xbf16, #tpu.memory_space<vmem>>, %arg2: memref<1024x256xbf16, #tpu.memory_space<vmem>>, %arg3: memref<8x128xf32, #tpu.memory_space<vmem>>) attributes {dimension_semantics = [#tpu.dimension_semantics<parallel>], iteration_bounds = array<i64: 8>, scalar_prefetch = 0 : i64, scratch_operands = 0 : i64, tpu.core_type = #tpu.core_type<tc>, window_params = [{pipeline_mode = #tpu.pipeline_mode<synchronous>, transform_indices = @transform_0, window_bounds = array<i64: 8, 1024>}, {transform_indices = @transform_1, window_bounds = array<i64: 1024, 256>}, {transform_indices = @transform_2, window_bounds = array<i64: 8, 128>}]} {
    %c0 = arith.constant 0 : index
    %c0_0 = arith.constant 0 : index
    %0 = vector.load %arg1[%c0, %c0_0] : memref<8x1024xbf16, #tpu.memory_space<vmem>>, vector<8x1024xbf16>
    %c0_1 = arith.constant 0 : index
    %c0_2 = arith.constant 0 : index
    %1 = vector.load %arg2[%c0_1, %c0_2] : memref<1024x256xbf16, #tpu.memory_space<vmem>>, vector<1024x256xbf16>
    %cst = arith.constant dense<0.000000e+00> : vector<8x256xf32>
    %2 = tpu.matmul %0, %1, %cst {dimension_numbers = #tpu.dot_dimension_numbers<[1], [0], [0], [1], [0, 0, 1, 1], [], []>} : vector<8x1024xbf16>, vector<1024x256xbf16>, vector<8x256xf32> -> vector<8x256xf32>
    %3 = vector.extract_strided_slice %2 {offsets = [0, 0], sizes = [4, 128], strides = [1, 1]} : vector<8x256xf32> to vector<4x128xf32>
    %4 = vector.extract_strided_slice %2 {offsets = [4, 128], sizes = [4, 128], strides = [1, 1]} : vector<8x256xf32> to vector<4x128xf32>
    %5 = arith.subf %3, %4 : vector<4x128xf32>
    %6 = vector.extract_strided_slice %2 {offsets = [0, 128], sizes = [4, 128], strides = [1, 1]} : vector<8x256xf32> to vector<4x128xf32>
    %7 = vector.extract_strided_slice %2 {offsets = [4, 0], sizes = [4, 128], strides = [1, 1]} : vector<8x256xf32> to vector<4x128xf32>
    %8 = arith.addf %6, %7 : vector<4x128xf32>
    %9 = tpu.concatenate %5, %8 in 0 : vector<4x128xf32>, vector<4x128xf32> -> vector<8x128xf32>
    %c0_3 = arith.constant 0 : index
    %c0_4 = arith.constant 0 : index
    %10 = vector.load %arg3[%c0_3, %c0_4] : memref<8x128xf32, #tpu.memory_space<vmem>>, vector<8x128xf32>
    tpu.vector_store %arg3[%c0_3, %c0_4], %9 {strides = array<i32>} : memref<8x128xf32, #tpu.memory_space<vmem>>, vector<8x128xf32>,
    return
  }
  func.func @transform_0(%arg0: i32) -> (i32, i32) {
    %c0_i32 = arith.constant 0 : i32
    %c0_i32_0 = arith.constant 0 : i32
    %c0_i32_1 = arith.constant 0 : i32
    return %c0_i32, %c0_i32_0 : i32, i32
  }
  func.func @transform_1(%arg0: i32) -> (i32, i32) {
    %c0_i32 = arith.constant 0 : i32
    %c0_i32_0 = arith.constant 0 : i32
    return %c0_i32, %arg0 : i32, i32
  }
  func.func @transform_2(%arg0: i32) -> (i32, i32) {
    %c0_i32 = arith.constant 0 : i32
    %c0_i32_0 = arith.constant 0 : i32
    return %c0_i32, %arg0 : i32, i32
  }
}

</mosaic_0001>

<bundles_post_ra>
// kernel: custom-call.1
= control target key start
LH: loop header
LB: loop body
LE: loop exit
PB: predicated region body
PF: predicated region fallthrough
CT: control target
= control target key end

     0   :  { %s105_s0 = inlined_call_operand.vmem [shape: f32[2,32,32], index: 0, kind: input, shape index: {}]   ;;  %s106_s1 = inlined_call_operand.vmem [shape: f32[2,32,32], index: 1, kind: input, shape index: {}]   ;;  %s107_s2 = inlined_call_operand.hbm [shape: c64[2,32,32], index: 2, kind: output, shape index: {}]  }
   0x1   :  { %s3_s11 = scalar_lea.hbm %s107_s2, 64 }
   0x2   :  { %4 = vsyncpa [#allocation0], 0  ;;  %s6_s14 = sshll.u32 %s105_s0, 4  ;;  %s8_s17 = sshll.u32 %s107_s2, 4  ;;  %s7_s14 = int_to_ptr.vmem [resolvable:$true] %s6_s14  ;;  %s9_s17 = int_to_ptr.hbm [resolvable:$true] %s8_s17 }
   0x3   :  { %11 = dma.vmem_to_hbm [thread:$0]  %s7_s14, 1024, %s9_s17, [#allocation0] }
   0x4   :  { %74 = dma.done.wait [#allocation0], 1024  }
   0x5   :  { %75 = vsyncadd [#allocation0], 4294966272 }
   0x6   :  { %14 = vsyncpa [#allocation0], 1 }
   0x7   :  { %15 = vsyncpa [#allocation1], 0  ;;  %s17_s20 = sshll.u32 %s106_s1, 4  ;;  %s19_s21 = sshll.u32 %s3_s11, 4  ;;  %s18_s20 = int_to_ptr.vmem [resolvable:$true] %s17_s20  ;;  %s20_s21 = int_to_ptr.hbm [resolvable:$true] %s19_s21 }
   0x8   :  { %22 = dma.vmem_to_hbm [thread:$0]  %s18_s20, 1024, %s20_s21, [#allocation1] }
   0x9   :  { %76 = dma.done.wait [#allocation1], 1024  }
   0xa   :  { %77 = vsyncadd [#allocation1], 4294966272 }
   0xb   :  { %25 = vsyncpa [#allocation1], 1 }

// kernel: _net_forward_jit.1
= control target key start
LH: loop header
LB: loop body
LE: loop exit
PB: predicated region body
PF: predicated region fallthrough
CT: control target
= control target key end

     0   :  { %7 = vsyncpa [#allocation3], 0  ;;  %s2422_s0 = inlined_call_operand.vmem [shape: bf16[8,1024], index: 0, kind: input, shape index: {}]   ;;  %s2423_s1 = inlined_call_operand.hbm [shape: bf16[1024,2048], index: 1, kind: input, shape index: {}]   ;;  %s2424_s2 = inlined_call_operand.vmem [shape: f32[8,1024], index: 2, kind: output, shape index: {}]  }
   0x1   :  { %9 = vsyncpa [#allocation3 + $0x1], 0  ;;  %s2030_s9 = smov 0   ;;  %s2032_s10 = smov 0  }
   0x2   :  { %s2034_s11 = smov 0   ;;  %s2036_s12 = smov 0  }
   0x3 LB: > { %s2049_s13 = sadd.s32 4294967295, %s2010_s12   ;;  %s2052_s14 = sadd.s32 1, %s2010_s12   ;;  %s2010_s12 = sphi %s2036_s12, %s2431_s12   ;;  %s2006_s11 = sphi %s2034_s11, %s2430_s11   ;;  %s2002_s10 = sphi %s2032_s10, %s2429_s10   ;;  %s1998_s9 = sphi %s2030_s9, %s2428_s9  }
   0x4   : > { %s40_s15 = ssub.s32 %s2010_s12, %s2052_s14  ;;  %s43_s16 = sadd.s32 1, %s2006_s11 }
   0x5   : > { %p41_p0 = scmp.eq.s32.totalorder %s40_s15, 0  ;;  %p50_p1 = scmp.ne.s32.totalorder %s2006_s11, %s2002_s10 }
   0x6   : > { %p51_p2 = scmp.eq.s32.totalorder %s2010_s12, 0  ;;  %p56_p3 = scmp.ne.s32.totalorder %s2002_s10, %s1998_s9 }
   0x7   : > { %s2062_s17 = scalar_select %p41_p0, %s2006_s11, %s43_s16  }
   0x8   : > { %p2064_p4 = por %p51_p2, %p50_p1  ;;  %p57_p5 = scmp.eq.s32.totalorder %s2049_s13, 0 }
   0x9   : > { %p1910_p6 = scmp.lt.s32.totalorder %s2010_s12, 8  ;;  %s109_s20 = sand.u32 1, %s2006_s11  }
   0xa   : > { %p2070_p7 = por %p57_p5, %p56_p3  ;;  %s1255_s21 = sshll.u32 %s109_s20, 10 }
   0xb   : > { %s1775_s22 = sshll.u32 %s2010_s12, 3  ;;  %s113_s26 = scalar_lea.vmem [#allocation2], %s1255_s21 }
   0xc   : > { %s118_s25 = scalar_lea.hbm %s2423_s1, %s1775_s22  ;;  %s121_s27 = sshll.u32 %s113_s26, 4  ;;  %s122_s27 = int_to_ptr.vmem [resolvable:$true] %s121_s27 }
   0xd   : > { %s119_s28 = sshll.u32 %s118_s25, 4  ;;  %p2081_p8 = pnand %p1910_p6, %p2064_p4  ;;  %s120_s28 = int_to_ptr.hbm [resolvable:$true] %s119_s28 }
   0xe   : > { %s110_s30 = scalar_lea.sflag [#allocation3], %s109_s20  ;;  %s1946_s3 = sshra.s32 %s120_s28, 4  ;;  %s1947_s3 = int_to_ptr.hbm [resolvable:$true] %s1946_s3 }
   0xf   : > { %s1948_s4 = scalar_lea.hbm %s1947_s3, 1024  ;;  %p1950_p10 = pneg %p2081_p8 }
  0x10   : > { %p1949_p9 = scmp.ne.s32.totalorder %s1947_s3, %s1948_s4  ;;  %s1953_s7 = scalar_lea.hbm %s2423_s1, 8192 }
  0x11   : > { %p1954_p13 = scmp.lt.s32.totalorder %s1947_s3, %s2423_s1  ;;  %p1955_p0 = scmp.lt.s32.totalorder %s1953_s7, %s1948_s4 }
  0x12   : > { %p1951_p11 = pnand %p1950_p10, %p1949_p9 }
  0x13   : > { %p1956_p1 = por %p1955_p0, %p1954_p13 }
  0x14   : > { %p1952_p12 = pneg %p1951_p11 }
  0x16   : > { %p1957_p2 = pnand %p1956_p1, %p1952_p12 }
  0x18   : > { %1960 = shalt.err (!%p1957_p2)
}
  0x19   : > { %s2012_s15 = smov 1024   ;;  %s2013_s16 = smov 128  }
  0x1a   : > { %s2014_s18 = smov 8   ;;  %p1258_p3 = scmp.ge.s32.totalorder %s2010_s12, 1 }
  0x1b   : > { %1909 = dma.hbm_to_vmem [thread:$0]  (!%p2081_p8), %s120_s28, 16384, %s122_s27, %s110_s30, %s2012_s15, %s2013_s16, %s2014_s18  }
  0x1c   : > { %p129_p4 = scmp.lt.s32.totalorder %s2010_s12, 9 }
  0x1e   : > { %p130_p5 = pnand %p1258_p3, %p129_p4 }
  0x1f   : > { %s135_s20 = sand.u32 (!%p130_p5), 1, %s2002_s10  }
  0x20   : > { %133 = sbr.rel (%p130_p5) target bundleno = 312 (0x138), region = 28  ;;  %s1259_s21 = sshll.u32 (!%p130_p5), %s135_s20, 10 }
  0x21   : > { %s136_s22 = scalar_lea.sflag (!%p130_p5), [#allocation3], %s135_s20  ;;  %s2098_s23 = scalar_lea.vmem (!%p130_p5), [#allocation2], %s1259_s21 }
  0x25   : > { %1993 = dma.done.wait (%p2070_p7), %s136_s22, 16384  }
  0x26   : > { %1995 = vsyncadd (%p2070_p7), %s136_s22, 4294950912  ;;  %v1319_v0 = vld [vmem:[%s2098_s23 + $0x70] sm:$0xf]  ;;  %v1791_v1 = vld [vmem:[%s2098_s23 + $0x74] sm:$0xf0]  ;;  %p161_p6 = scmp.lt.s32.totalorder %s2049_s13, 7 }
  0x27   : > { %v1383_v2 = vld [vmem:[%s2098_s23 + $0xf0] sm:$0xf]  ;;  %v1320_v3 = vor.u32 %v1791_v1, %v1319_v0  ;;  %v1807_v4 = vld [vmem:[%s2098_s23 + $0xf4] sm:$0xf0]  ;;  %v1311_v11 = vld [vmem:[%s2098_s23 + $0x60] sm:$0xf] }
  0x28   : > { %v1447_v5 = vld [vmem:[%s2098_s23 + $0x170] sm:$0xf]  ;;  %v1823_v6 = vld [vmem:[%s2098_s23 + $0x174] sm:$0xf0]  ;;  %v1384_v7 = vor.u32 %v1807_v4, %v1383_v2  ;;  %v1789_v13 = vld [vmem:[%s2098_s23 + $0x64] sm:$0xf0] }
  0x29   : > { %v1448_v8 = vor.u32 %v1823_v6, %v1447_v5  ;;  %v1511_v9 = vld [vmem:[%s2098_s23 + $0x1f0] sm:$0xf]  ;;  %v1839_v10 = vld [vmem:[%s2098_s23 + $0x1f4] sm:$0xf0]  ;;  %965 = vmatpush.bf16.msra.mxu0 %v1320_v3  ;;  %v1375_v14 = vld [vmem:[%s2098_s23 + $0xe0] sm:$0xf]  ;;  %v1312_v16 = vor.u32 %v1789_v13, %v1311_v11 }
  0x2a   : > { %v1512_v12 = vor.u32 %v1839_v10, %v1511_v9  ;;  %v1805_v15 = vld [vmem:[%s2098_s23 + $0xe4] sm:$0xf0]  ;;  %978 = vmatpush.bf16.msra.mxu1 %v1384_v7  ;;  %v1439_v18 = vld [vmem:[%s2098_s23 + $0x160] sm:$0xf]  ;;  %v1303_v23 = vld [vmem:[%s2098_s23 + $0x50] sm:$0xf] }
  0x2b   : > { %991 = vmatpush.bf16.msra.mxu2 %v1448_v8  ;;  %v1376_v17 = vor.u32 %v1805_v15, %v1375_v14  ;;  %v1821_v19 = vld [vmem:[%s2098_s23 + $0x164] sm:$0xf0]  ;;  %v1503_v20 = vld [vmem:[%s2098_s23 + $0x1e0] sm:$0xf]  ;;  %v1787_v24 = vld [vmem:[%s2098_s23 + $0x54] sm:$0xf0] }
  0x2c   : > { %1004 = vmatpush.bf16.msra.mxu3 %v1512_v12  ;;  %v1440_v21 = vor.u32 %v1821_v19, %v1439_v18  ;;  %v1837_v22 = vld [vmem:[%s2098_s23 + $0x1e4] sm:$0xf0]  ;;  %v1367_v26 = vld [vmem:[%s2098_s23 + $0xd0] sm:$0xf]  ;;  %v1803_v27 = vld [vmem:[%s2098_s23 + $0xd4] sm:$0xf0]  ;;  %v1304_v29 = vor.u32 %v1787_v24, %v1303_v23 }
  0x2d   : > { %v1504_v25 = vor.u32 %v1837_v22, %v1503_v20  ;;  %v1431_v28 = vld [vmem:[%s2098_s23 + $0x150] sm:$0xf]  ;;  %966 = vmatpush.bf16.msra.mxu0 %v1312_v16  ;;  %v1819_v30 = vld [vmem:[%s2098_s23 + $0x154] sm:$0xf0]  ;;  %v1368_v33 = vor.u32 %v1803_v27, %v1367_v26  ;;  %v1295_v35 = vld [vmem:[%s2098_s23 + $0x40] sm:$0xf] }
  0x2e   : > { %v1495_v31 = vld [vmem:[%s2098_s23 + $0x1d0] sm:$0xf]  ;;  %v1835_v32 = vld [vmem:[%s2098_s23 + $0x1d4] sm:$0xf0]  ;;  %979 = vmatpush.bf16.msra.mxu1 %v1376_v17  ;;  %v1432_v34 = vor.u32 %v1819_v30, %v1431_v28  ;;  %v1785_v36 = vld [vmem:[%s2098_s23 + $0x44] sm:$0xf0] }
  0x2f   : > { %992 = vmatpush.bf16.msra.mxu2 %v1440_v21  ;;  %v1359_v37 = vld [vmem:[%s2098_s23 + $0xc0] sm:$0xf]  ;;  %v1496_v38 = vor.u32 %v1835_v32, %v1495_v31  ;;  %v1801_v39 = vld [vmem:[%s2098_s23 + $0xc4] sm:$0xf0]  ;;  %v1296_v44 = vor.u32 %v1785_v36, %v1295_v35  ;;  %v1287_v47 = vld [vmem:[%s2098_s23 + $0x30] sm:$0xf] }
  0x30   : > { %1005 = vmatpush.bf16.msra.mxu3 %v1504_v25  ;;  %v1423_v40 = vld [vmem:[%s2098_s23 + $0x140] sm:$0xf]  ;;  %v1817_v41 = vld [vmem:[%s2098_s23 + $0x144] sm:$0xf0]  ;;  %v1360_v45 = vor.u32 %v1801_v39, %v1359_v37  ;;  %v1783_v48 = vld [vmem:[%s2098_s23 + $0x34] sm:$0xf0] }
  0x31   : > { %v1487_v42 = vld [vmem:[%s2098_s23 + $0x1c0] sm:$0xf]  ;;  %v1833_v43 = vld [vmem:[%s2098_s23 + $0x1c4] sm:$0xf0]  ;;  %967 = vmatpush.bf16.msra.mxu0 %v1304_v29  ;;  %v1424_v46 = vor.u32 %v1817_v41, %v1423_v40  ;;  %v1351_v49 = vld [vmem:[%s2098_s23 + $0xb0] sm:$0xf]  ;;  %v1288_v56 = vor.u32 %v1783_v48, %v1287_v47 }
  0x32   : > { %980 = vmatpush.bf16.msra.mxu1 %v1368_v33  ;;  %v1488_v50 = vor.u32 %v1833_v43, %v1487_v42  ;;  %v1799_v51 = vld [vmem:[%s2098_s23 + $0xb4] sm:$0xf0]  ;;  %v1415_v52 = vld [vmem:[%s2098_s23 + $0x130] sm:$0xf]  ;;  %v1279_v59 = vld [vmem:[%s2098_s23 + $0x20] sm:$0xf] }
  0x33   : > { %993 = vmatpush.bf16.msra.mxu2 %v1432_v34  ;;  %v1815_v53 = vld [vmem:[%s2098_s23 + $0x134] sm:$0xf0]  ;;  %v1479_v54 = vld [vmem:[%s2098_s23 + $0x1b0] sm:$0xf]  ;;  %v1352_v57 = vor.u32 %v1799_v51, %v1351_v49  ;;  %v1781_v60 = vld [vmem:[%s2098_s23 + $0x24] sm:$0xf0] }
  0x34   : > { %1006 = vmatpush.bf16.msra.mxu3 %v1496_v38  ;;  %v1831_v55 = vld [vmem:[%s2098_s23 + $0x1b4] sm:$0xf0]  ;;  %v1416_v58 = vor.u32 %v1815_v53, %v1415_v52  ;;  %v1343_v61 = vld [vmem:[%s2098_s23 + $0xa0] sm:$0xf]  ;;  %v1797_v63 = vld [vmem:[%s2098_s23 + $0xa4] sm:$0xf0]  ;;  %v1280_v4 = vor.u32 %v1781_v60, %v1279_v59 }
  0x35   : > { %968 = vmatpush.bf16.msra.mxu0 %v1296_v44  ;;  %v1480_v62 = vor.u32 %v1831_v55, %v1479_v54  ;;  %v1407_v0 = vld [vmem:[%s2098_s23 + $0x120] sm:$0xf]  ;;  %v1813_v1 = vld [vmem:[%s2098_s23 + $0x124] sm:$0xf0]  ;;  %v1344_v5 = vor.u32 %v1797_v63, %v1343_v61  ;;  %v1271_v7 = vld [vmem:[%s2098_s23 + $0x10] sm:$0xf] }
  0x36   : > { %981 = vmatpush.bf16.msra.mxu1 %v1360_v45  ;;  %v1471_v2 = vld [vmem:[%s2098_s23 + $0x1a0] sm:$0xf]  ;;  %v1829_v3 = vld [vmem:[%s2098_s23 + $0x1a4] sm:$0xf0]  ;;  %v1408_v6 = vor.u32 %v1813_v1, %v1407_v0  ;;  %v1779_v8 = vld [vmem:[%s2098_s23 + $0x14] sm:$0xf0] }
  0x37   : > { %994 = vmatpush.bf16.msra.mxu2 %v1424_v46  ;;  %v1335_v9 = vld [vmem:[%s2098_s23 + $0x90] sm:$0xf]  ;;  %v1472_v10 = vor.u32 %v1829_v3, %v1471_v2  ;;  %v1795_v11 = vld [vmem:[%s2098_s23 + $0x94] sm:$0xf0]  ;;  %v1272_v16 = vor.u32 %v1779_v8, %v1271_v7  ;;  %v1263_v17 = vld [vmem:[%s2098_s23] sm:$0xf] }
  0x38   : > { %1007 = vmatpush.bf16.msra.mxu3 %v1488_v50  ;;  %v1399_v12 = vld [vmem:[%s2098_s23 + $0x110] sm:$0xf]  ;;  %v1811_v13 = vld [vmem:[%s2098_s23 + $0x114] sm:$0xf0]  ;;  %v1777_v18 = vld [vmem:[%s2098_s23 + $0x4] sm:$0xf0]  ;;  %v1336_v19 = vor.u32 %v1795_v11, %v1335_v9 }
  0x39   : > { %969 = vmatpush.bf16.msra.mxu0 %v1288_v56  ;;  %v1463_v14 = vld [vmem:[%s2098_s23 + $0x190] sm:$0xf]  ;;  %v1827_v15 = vld [vmem:[%s2098_s23 + $0x194] sm:$0xf0]  ;;  %v1400_v20 = vor.u32 %v1811_v13, %v1399_v12  ;;  %v1327_v21 = vld [vmem:[%s2098_s23 + $0x80] sm:$0xf]  ;;  %v1264_v31 = vor.u32 %v1777_v18, %v1263_v17 }
  0x3a   : > { %982 = vmatpush.bf16.msra.mxu1 %v1352_v57  ;;  %v1793_v22 = vld [vmem:[%s2098_s23 + $0x84] sm:$0xf0]  ;;  %v1391_v23 = vld [vmem:[%s2098_s23 + $0x100] sm:$0xf]  ;;  %v1464_v24 = vor.u32 %v1827_v15, %v1463_v14  ;;  %v1575_v28 = vld [vmem:[%s2098_s23 + $0x270] sm:$0xf] }
  0x3b   : > { %995 = vmatpush.bf16.msra.mxu2 %v1416_v58  ;;  %v1809_v25 = vld [vmem:[%s2098_s23 + $0x104] sm:$0xf0]  ;;  %v1455_v26 = vld [vmem:[%s2098_s23 + $0x180] sm:$0xf]  ;;  %v1855_v29 = vld [vmem:[%s2098_s23 + $0x274] sm:$0xf0]  ;;  %v1328_v35 = vor.u32 %v1793_v22, %v1327_v21 }
  0x3c   : > { %1008 = vmatpush.bf16.msra.mxu3 %v1480_v62  ;;  %v1825_v27 = vld [vmem:[%s2098_s23 + $0x184] sm:$0xf0]  ;;  %v1639_v30 = vld [vmem:[%s2098_s23 + $0x2f0] sm:$0xf]  ;;  %v1871_v32 = vld [vmem:[%s2098_s23 + $0x2f4] sm:$0xf0]  ;;  %v1392_v36 = vor.u32 %v1809_v25, %v1391_v23  ;;  %v1576_v40 = vor.u32 %v1855_v29, %v1575_v28 }
  0x3d   : > { %970 = vmatpush.bf16.msra.mxu0 %v1280_v4  ;;  %v1703_v33 = vld [vmem:[%s2098_s23 + $0x370] sm:$0xf]  ;;  %v1887_v34 = vld [vmem:[%s2098_s23 + $0x374] sm:$0xf0]  ;;  %v1456_v39 = vor.u32 %v1825_v27, %v1455_v26  ;;  %v1640_v41 = vor.u32 %v1871_v32, %v1639_v30  ;;  %v1567_v43 = vld [vmem:[%s2098_s23 + $0x260] sm:$0xf] }
  0x3e   : > { %983 = vmatpush.bf16.msra.mxu1 %v1344_v5  ;;  %v1767_v37 = vld [vmem:[%s2098_s23 + $0x3f0] sm:$0xf]  ;;  %v1903_v38 = vld [vmem:[%s2098_s23 + $0x3f4] sm:$0xf0]  ;;  %v1704_v42 = vor.u32 %v1887_v34, %v1703_v33  ;;  %v1853_v44 = vld [vmem:[%s2098_s23 + $0x264] sm:$0xf0] }
  0x3f   : > { %996 = vmatpush.bf16.msra.mxu2 %v1408_v6  ;;  %v1631_v45 = vld [vmem:[%s2098_s23 + $0x2e0] sm:$0xf]  ;;  %v1768_v46 = vor.u32 %v1903_v38, %v1767_v37  ;;  %v1869_v47 = vld [vmem:[%s2098_s23 + $0x2e4] sm:$0xf0]  ;;  %v1568_v52 = vor.u32 %v1853_v44, %v1567_v43  ;;  %v1559_v53 = vld [vmem:[%s2098_s23 + $0x250] sm:$0xf] }
  0x40   : > { %1009 = vmatpush.bf16.msra.mxu3 %v1472_v10  ;;  %v1695_v48 = vld [vmem:[%s2098_s23 + $0x360] sm:$0xf]  ;;  %v1885_v49 = vld [vmem:[%s2098_s23 + $0x364] sm:$0xf0]  ;;  %v1632_v54 = vor.u32 %v1869_v47, %v1631_v45  ;;  %v1851_v56 = vld [vmem:[%s2098_s23 + $0x254] sm:$0xf0] }
  0x41   : > { %971 = vmatpush.bf16.msra.mxu0 %v1272_v16  ;;  %v1759_v50 = vld [vmem:[%s2098_s23 + $0x3e0] sm:$0xf]  ;;  %v1901_v51 = vld [vmem:[%s2098_s23 + $0x3e4] sm:$0xf0]  ;;  %v1696_v55 = vor.u32 %v1885_v49, %v1695_v48  ;;  %v1623_v57 = vld [vmem:[%s2098_s23 + $0x2d0] sm:$0xf]  ;;  %v1560_v3 = vor.u32 %v1851_v56, %v1559_v53 }
  0x42   : > { %984 = vmatpush.bf16.msra.mxu1 %v1336_v19  ;;  %v166_v58 = vld [vmem:[%s2422_s0 + $0x8] sm:$0xff]  ;;  %v1760_v59 = vor.u32 %v1901_v51, %v1759_v50  ;;  %v1867_v60 = vld [vmem:[%s2098_s23 + $0x2d4] sm:$0xf0]  ;;  %v1687_v61 = vld [vmem:[%s2098_s23 + $0x350] sm:$0xf]  ;;  %s2433_s13 = smov (!%p161_p6, %s2049_s13), 7 }
  0x43   : > { %997 = vmatpush.bf16.msra.mxu2 %v1400_v20  ;;  %v1883_v62 = vld [vmem:[%s2098_s23 + $0x354] sm:$0xf0]  ;;  %v303_v63 = vunpack.c.l.b16 %v166_v58  ;;  %v304_v0 = vunpack.c.h.b16 %v166_v58  ;;  %v1751_v1 = vld [vmem:[%s2098_s23 + $0x3d0] sm:$0xf]  ;;  %v165_v5 = vld [vmem:[%s2422_s0] sm:$0xff]  ;;  %v1624_v7 = vor.u32 %v1867_v60, %v1623_v57  ;;  %s1260_s30 = sshll.u32 %s2433_s13, 3 }
  0x44   : > { %1010 = vmatpush.bf16.msra.mxu3 %v1464_v24  ;;  %v1899_v2 = vld [vmem:[%s2098_s23 + $0x3d4] sm:$0xf0]  ;;  %v1688_v8 = vor.u32 %v1883_v62, %v1687_v61  ;;  %v1551_v9 = vld [vmem:[%s2098_s23 + $0x240] sm:$0xf]  ;;  %v1849_v10 = vld [vmem:[%s2098_s23 + $0x244] sm:$0xf0]  ;;  %v301_v12 = vunpack.c.l.b16 %v165_v5  ;;  %v302_v13 = vunpack.c.h.b16 %v165_v5  ;;  %s164_s5 = scalar_lea.vmem %s2424_s2, %s1260_s30 }
  0x45   : > { %972 = vmatpush.bf16.msra.mxu0 %v1264_v31  ;;  %v2195_v4 = vpack.c.b16 %v303_v63, %v303_v63  ;;  %v2200_v6 = vpack.c.b16 %v304_v0, %v304_v0  ;;  %v1615_v11 = vld [vmem:[%s2098_s23 + $0x2c0] sm:$0xf]  ;;  %v1752_v14 = vor.u32 %v1899_v2, %v1751_v1  ;;  %v1865_v15 = vld [vmem:[%s2098_s23 + $0x2c4] sm:$0xf0]  ;;  %v1552_v22 = vor.u32 %v1849_v10, %v1551_v9  ;;  %v1543_v25 = vld [vmem:[%s2098_s23 + $0x230] sm:$0xf] }
  0x46   : > { %985 = vmatpush.bf16.msra.mxu1 %v1328_v35  ;;  %v1679_v16 = vld [vmem:[%s2098_s23 + $0x340] sm:$0xf]  ;;  %v1881_v17 = vld [vmem:[%s2098_s23 + $0x344] sm:$0xf0]  ;;  %v2211_v20 = vpack.c.b16 %v301_v12, %v301_v12  ;;  %v2214_v21 = vpack.c.b16 %v302_v13, %v302_v13  ;;  %v1616_v23 = vor.u32 %v1865_v15, %v1615_v11  ;;  %v1847_v26 = vld [vmem:[%s2098_s23 + $0x234] sm:$0xf0] }
  0x47   : > { %998 = vmatpush.bf16.msra.mxu2 %v1392_v36  ;;  %v1743_v18 = vld [vmem:[%s2098_s23 + $0x3c0] sm:$0xf]  ;;  %v1897_v19 = vld [vmem:[%s2098_s23 + $0x3c4] sm:$0xf0]  ;;  %v1680_v24 = vor.u32 %v1881_v17, %v1679_v16  ;;  %v1607_v27 = vld [vmem:[%s2098_s23 + $0x2b0] sm:$0xf]  ;;  %v1544_v34 = vor.u32 %v1847_v26, %v1543_v25 }
  0x48   : > { %1011 = vmatpush.bf16.msra.mxu3 %v1456_v39  ;;  %v1744_v28 = vor.u32 %v1897_v19, %v1743_v18  ;;  %v1863_v29 = vld [vmem:[%s2098_s23 + $0x2b4] sm:$0xf0]  ;;  %v1671_v30 = vld [vmem:[%s2098_s23 + $0x330] sm:$0xf]  ;;  %973 = vmatmul.bf16.vlgmr.msra.gmra.mxu0 %v2211_v20  ;;  %v1535_v37 = vld [vmem:[%s2098_s23 + $0x220] sm:$0xf] }
  0x49   : > { %1017 = vmatpush.bf16.msrb.mxu0 %v1576_v40  ;;  %v1879_v31 = vld [vmem:[%s2098_s23 + $0x334] sm:$0xf0]  ;;  %v1735_v32 = vld [vmem:[%s2098_s23 + $0x3b0] sm:$0xf]  ;;  %986 = vmatmul.bf16.vlgmr.msra.gmra.mxu1 %v2214_v21  ;;  %v1608_v35 = vor.u32 %v1863_v29, %v1607_v27  ;;  %v1845_v38 = vld [vmem:[%s2098_s23 + $0x224] sm:$0xf0] }
  0x4a   : > { %1030 = vmatpush.bf16.msrb.mxu1 %v1640_v41  ;;  %999 = vmatmul.bf16.vlgmr.msra.gmra.mxu2 %v2195_v4  ;;  %v1895_v33 = vld [vmem:[%s2098_s23 + $0x3b4] sm:$0xf0]  ;;  %v1672_v36 = vor.u32 %v1879_v31, %v1671_v30  ;;  %v1599_v39 = vld [vmem:[%s2098_s23 + $0x2a0] sm:$0xf]  ;;  %v1861_v41 = vld [vmem:[%s2098_s23 + $0x2a4] sm:$0xf0] }
  0x4b   : > { %1043 = vmatpush.bf16.msrb.mxu2 %v1704_v42  ;;  %1012 = vmatmul.bf16.vlgmr.msra.gmra.mxu3 %v2200_v6  ;;  %v1736_v40 = vor.u32 %v1895_v33, %v1735_v32  ;;  %v1663_v42 = vld [vmem:[%s2098_s23 + $0x320] sm:$0xf]  ;;  %v1877_v43 = vld [vmem:[%s2098_s23 + $0x324] sm:$0xf0]  ;;  %v1600_v47 = vor.u32 %v1861_v41, %v1599_v39  ;;  %v1527_v49 = vld [vmem:[%s2098_s23 + $0x210] sm:$0xf] }
  0x4c   : > { %1056 = vmatpush.bf16.msrb.mxu3 %v1768_v46  ;;  %v1727_v44 = vld [vmem:[%s2098_s23 + $0x3a0] sm:$0xf]  ;;  %v1893_v45 = vld [vmem:[%s2098_s23 + $0x3a4] sm:$0xf0]  ;;  %v1536_v46 = vor.u32 %v1845_v38, %v1535_v37  ;;  %v1664_v48 = vor.u32 %v1877_v43, %v1663_v42  ;;  %v1843_v50 = vld [vmem:[%s2098_s23 + $0x214] sm:$0xf0] }
  0x4d   : > { %1018 = vmatpush.bf16.msrb.mxu0 %v1568_v52  ;;  %v1591_v51 = vld [vmem:[%s2098_s23 + $0x290] sm:$0xf]  ;;  %v1728_v52 = vor.u32 %v1893_v45, %v1727_v44  ;;  %v1859_v53 = vld [vmem:[%s2098_s23 + $0x294] sm:$0xf0]  ;;  %v1519_v58 = vld [vmem:[%s2098_s23 + $0x200] sm:$0xf] }
  0x4e   : > { %1031 = vmatpush.bf16.msrb.mxu1 %v1632_v54  ;;  %v1655_v54 = vld [vmem:[%s2098_s23 + $0x310] sm:$0xf]  ;;  %v1891_v57 = vld [vmem:[%s2098_s23 + $0x394] sm:$0xf0]  ;;  %v1841_v60 = vld [vmem:[%s2098_s23 + $0x204] sm:$0xf0]  ;;  %v1592_v63 = vor.u32 %v1859_v53, %v1591_v51 }
  0x4f   : > { %1044 = vmatpush.bf16.msrb.mxu2 %v1696_v55  ;;  %v1875_v55 = vld [vmem:[%s2098_s23 + $0x314] sm:$0xf0]  ;;  %v1719_v56 = vld [vmem:[%s2098_s23 + $0x390] sm:$0xf]  ;;  %v1583_v61 = vld [vmem:[%s2098_s23 + $0x280] sm:$0xf]  ;;  %v1520_v13 = vor.u32 %v1841_v60, %v1519_v58 }
  0x50   : > { %1057 = vmatpush.bf16.msrb.mxu3 %v1760_v59  ;;  %v1528_v59 = vor.u32 %v1843_v50, %v1527_v49  ;;  %v1857_v62 = vld [vmem:[%s2098_s23 + $0x284] sm:$0xf0]  ;;  %v1656_v0 = vor.u32 %v1875_v55, %v1655_v54  ;;  %v1647_v1 = vld [vmem:[%s2098_s23 + $0x300] sm:$0xf]  ;;  %v1720_v5 = vor.u32 %v1891_v57, %v1719_v56  ;;  %v167_v9 = vld [vmem:[%s2422_s0 + $0x10] sm:$0xff]  ;;  %vm1184_vm0 = vcmask 1043456  }
  0x51   : > { %1019 = vmatpush.bf16.msrb.mxu0 %v1560_v3  ;;  %v1873_v2 = vld [vmem:[%s2098_s23 + $0x304] sm:$0xf0]  ;;  %v168_v3 = vld [vmem:[%s2422_s0 + $0x18] sm:$0xff]  ;;  %v1790_v10 = vld [vmem:[%s2098_s23 + $0x74] sm:$0xf]  ;;  %v1584_v18 = vor.u32 %v1857_v62, %v1583_v61 }
  0x52   : > { %1032 = vmatpush.bf16.msrb.mxu1 %v1624_v7  ;;  %v1711_v7 = vld [vmem:[%s2098_s23 + $0x380] sm:$0xf]  ;;  %v1321_v11 = vld [vmem:[%s2098_s23 + $0x78] sm:$0xf0]  ;;  %v1806_v12 = vld [vmem:[%s2098_s23 + $0xf4] sm:$0xf]  ;;  %v307_v17 = vunpack.c.l.b16 %v168_v3  ;;  %v1648_v19 = vor.u32 %v1873_v2, %v1647_v1  ;;  %v308_v25 = vunpack.c.h.b16 %v168_v3 }
  0x53   : > { %1045 = vmatpush.bf16.msrb.mxu2 %v1688_v8  ;;  %v1889_v8 = vld [vmem:[%s2098_s23 + $0x384] sm:$0xf0]  ;;  %v1822_v15 = vld [vmem:[%s2098_s23 + $0x174] sm:$0xf]  ;;  %v1449_v16 = vld [vmem:[%s2098_s23 + $0x178] sm:$0xf0]  ;;  %v1324_v27 = vor.u32 %v1790_v10, %v1321_v11 }
  0x54   : > { %1058 = vmatpush.bf16.msrb.mxu3 %v1752_v14  ;;  %v1385_v14 = vld [vmem:[%s2098_s23 + $0xf8] sm:$0xf0]  ;;  %v1712_v26 = vor.u32 %v1889_v8, %v1711_v7  ;;  %v1452_v30 = vor.u32 %v1822_v15, %v1449_v16  ;;  %v1788_v31 = vld [vmem:[%s2098_s23 + $0x64] sm:$0xf]  ;;  %v1313_v32 = vld [vmem:[%s2098_s23 + $0x68] sm:$0xf0]  ;;  %v2270_v38 = vpack.c.b16 %v307_v17, %v307_v17  ;;  %v2276_v42 = vpack.c.b16 %v308_v25, %v308_v25 }
  0x55   : > { %1020 = vmatpush.bf16.msrb.mxu0 %v1552_v22  ;;  %v1838_v22 = vld [vmem:[%s2098_s23 + $0x1f4] sm:$0xf]  ;;  %v1388_v29 = vor.u32 %v1806_v12, %v1385_v14  ;;  %v1804_v33 = vld [vmem:[%s2098_s23 + $0xe4] sm:$0xf]  ;;  %v1441_v37 = vld [vmem:[%s2098_s23 + $0x168] sm:$0xf0]  ;;  %v1316_v43 = vor.u32 %v1788_v31, %v1313_v32 }
  0x56   : > { %1033 = vmatpush.bf16.msrb.mxu1 %v1616_v23  ;;  %v1513_v23 = vld [vmem:[%s2098_s23 + $0x1f8] sm:$0xf0]  ;;  %v1836_v39 = vld [vmem:[%s2098_s23 + $0x1e4] sm:$0xf]  ;;  %v1802_v49 = vld [vmem:[%s2098_s23 + $0xd4] sm:$0xf] }
  0x57   : > { %1046 = vmatpush.bf16.msrb.mxu2 %v1680_v24  ;;  %v305_v24 = vunpack.c.l.b16 %v167_v9  ;;  %v1369_v51 = vld [vmem:[%s2098_s23 + $0xd8] sm:$0xf0]  ;;  %v1834_v54 = vld [vmem:[%s2098_s23 + $0x1d4] sm:$0xf]  ;;  %v1297_v60 = vld [vmem:[%s2098_s23 + $0x48] sm:$0xf0] }
  0x58   : > { %1059 = vmatpush.bf16.msrb.mxu3 %v1744_v28  ;;  %v306_v28 = vunpack.c.h.b16 %v167_v9  ;;  %v1433_v53 = vld [vmem:[%s2098_s23 + $0x158] sm:$0xf0]  ;;  %v1372_v57 = vor.u32 %v1802_v49, %v1369_v51  ;;  %v1800_v61 = vld [vmem:[%s2098_s23 + $0xc4] sm:$0xf]  ;;  %v1425_v1 = vld [vmem:[%s2098_s23 + $0x148] sm:$0xf0] }
  0x59   : > { %1021 = vmatpush.bf16.msrb.mxu0 %v1544_v34  ;;  %v1516_v34 = vor.u32 %v1838_v22, %v1513_v23  ;;  %v2274_v41 = vpack.c.b16 %v305_v24, %v305_v24  ;;  %v1497_v55 = vld [vmem:[%s2098_s23 + $0x1d8] sm:$0xf0]  ;;  %v1832_v2 = vld [vmem:[%s2098_s23 + $0x1c4] sm:$0xf]  ;;  %v1489_v3 = vld [vmem:[%s2098_s23 + $0x1c8] sm:$0xf0] }
  0x5a   : > { %1034 = vmatpush.bf16.msrb.mxu1 %v1608_v35  ;;  %v1377_v35 = vld [vmem:[%s2098_s23 + $0xe8] sm:$0xf0]  ;;  %v2278_v44 = vpack.c.b16 %v306_v28, %v306_v28  ;;  %v1500_v62 = vor.u32 %v1834_v54, %v1497_v55  ;;  %v1782_v9 = vld [vmem:[%s2098_s23 + $0x34] sm:$0xf]  ;;  %v1289_v10 = vld [vmem:[%s2098_s23 + $0x38] sm:$0xf0]  ;;  %v1492_v12 = vor.u32 %v1832_v2, %v1489_v3 }
  0x5b   : > { %1047 = vmatpush.bf16.msrb.mxu2 %v1672_v36  ;;  %v1820_v36 = vld [vmem:[%s2098_s23 + $0x164] sm:$0xf]  ;;  %v1380_v45 = vor.u32 %v1804_v33, %v1377_v35  ;;  %v1798_v11 = vld [vmem:[%s2098_s23 + $0xb4] sm:$0xf]  ;;  %v1417_v15 = vld [vmem:[%s2098_s23 + $0x138] sm:$0xf0] }
  0x5c   : > { %1060 = vmatpush.bf16.msrb.mxu3 %v1736_v40  ;;  %v1505_v40 = vld [vmem:[%s2098_s23 + $0x1e8] sm:$0xf0]  ;;  %v1814_v14 = vld [vmem:[%s2098_s23 + $0x134] sm:$0xf]  ;;  %v1481_v17 = vld [vmem:[%s2098_s23 + $0x1b8] sm:$0xf0] }
  0x5d   : > { %1022 = vmatpush.bf16.msrb.mxu0 %v1536_v46  ;;  %v1444_v46 = vor.u32 %v1820_v36, %v1441_v37  ;;  %v1508_v50 = vor.u32 %v1836_v39, %v1505_v40  ;;  %v1830_v16 = vld [vmem:[%s2098_s23 + $0x1b4] sm:$0xf]  ;;  %v1420_v22 = vor.u32 %v1814_v14, %v1417_v15  ;;  %v1780_v23 = vld [vmem:[%s2098_s23 + $0x24] sm:$0xf]  ;;  %v1281_v24 = vld [vmem:[%s2098_s23 + $0x28] sm:$0xf0] }
  0x5e   : > { %1035 = vmatpush.bf16.msrb.mxu1 %v1600_v47  ;;  %v1786_v47 = vld [vmem:[%s2098_s23 + $0x54] sm:$0xf]  ;;  %v1796_v25 = vld [vmem:[%s2098_s23 + $0xa4] sm:$0xf]  ;;  %v1473_v31 = vld [vmem:[%s2098_s23 + $0x1a8] sm:$0xf0]  ;;  %v1284_v32 = vor.u32 %v1780_v23, %v1281_v24 }
  0x5f   : > { %1048 = vmatpush.bf16.msrb.mxu2 %v1664_v48  ;;  %v1305_v48 = vld [vmem:[%s2098_s23 + $0x58] sm:$0xf0]  ;;  %v1812_v28 = vld [vmem:[%s2098_s23 + $0x124] sm:$0xf]  ;;  %v1778_v35 = vld [vmem:[%s2098_s23 + $0x14] sm:$0xf] }
  0x60   : > { %1061 = vmatpush.bf16.msrb.mxu3 %v1728_v52  ;;  %v1818_v52 = vld [vmem:[%s2098_s23 + $0x154] sm:$0xf]  ;;  %v1308_v56 = vor.u32 %v1786_v47, %v1305_v48  ;;  %v1273_v36 = vld [vmem:[%s2098_s23 + $0x18] sm:$0xf0]  ;;  %v1776_v49 = vld [vmem:[%s2098_s23 + $0x4] sm:$0xf] }
  0x61   : > { %1023 = vmatpush.bf16.msrb.mxu0 %v1528_v59  ;;  %v1436_v58 = vor.u32 %v1818_v52, %v1433_v53  ;;  %v1784_v59 = vld [vmem:[%s2098_s23 + $0x44] sm:$0xf]  ;;  %v1794_v37 = vld [vmem:[%s2098_s23 + $0x94] sm:$0xf]  ;;  %v1337_v40 = vld [vmem:[%s2098_s23 + $0x98] sm:$0xf0]  ;;  %v1276_v48 = vor.u32 %v1778_v35, %v1273_v36 }
  0x62   : > { %1036 = vmatpush.bf16.msrb.mxu1 %v1592_v63  ;;  %v1361_v63 = vld [vmem:[%s2098_s23 + $0xc8] sm:$0xf0]  ;;  %v1465_v47 = vld [vmem:[%s2098_s23 + $0x198] sm:$0xf0]  ;;  %v1340_v51 = vor.u32 %v1794_v37, %v1337_v40  ;;  %v1792_v53 = vld [vmem:[%s2098_s23 + $0x84] sm:$0xf] }
  0x63   : > { %1049 = vmatpush.bf16.msrb.mxu2 %v1656_v0  ;;  %v1816_v0 = vld [vmem:[%s2098_s23 + $0x144] sm:$0xf]  ;;  %v1364_v7 = vor.u32 %v1800_v61, %v1361_v63  ;;  %v1329_v54 = vld [vmem:[%s2098_s23 + $0x88] sm:$0xf0]  ;;  %v1577_v61 = vld [vmem:[%s2098_s23 + $0x278] sm:$0xf0] }
  0x64   : > { %1062 = vmatpush.bf16.msrb.mxu3 %v1720_v5  ;;  %v1300_v5 = vor.u32 %v1784_v59, %v1297_v60  ;;  %v1428_v8 = vor.u32 %v1816_v0, %v1425_v1  ;;  %v1808_v55 = vld [vmem:[%s2098_s23 + $0x104] sm:$0xf]  ;;  %v1457_v59 = vld [vmem:[%s2098_s23 + $0x188] sm:$0xf0]  ;;  %v1854_v60 = vld [vmem:[%s2098_s23 + $0x274] sm:$0xf]  ;;  %v1332_v3 = vor.u32 %v1792_v53, %v1329_v54 }
  0x65   : > { %1024 = vmatpush.bf16.msrb.mxu0 %v1520_v13  ;;  %v1353_v13 = vld [vmem:[%s2098_s23 + $0xb8] sm:$0xf0]  ;;  %v1886_v1 = vld [vmem:[%s2098_s23 + $0x374] sm:$0xf]  ;;  %v1569_v14 = vld [vmem:[%s2098_s23 + $0x268] sm:$0xf0] }
  0x66   : > { %1037 = vmatpush.bf16.msrb.mxu1 %v1584_v18  ;;  %v1292_v18 = vor.u32 %v1782_v9, %v1289_v10  ;;  %v1641_v0 = vld [vmem:[%s2098_s23 + $0x2f8] sm:$0xf0]  ;;  %v1580_v10 = vor.u32 %v1854_v60, %v1577_v61  ;;  %v1868_v15 = vld [vmem:[%s2098_s23 + $0x2e4] sm:$0xf]  ;;  %v1761_v23 = vld [vmem:[%s2098_s23 + $0x3e8] sm:$0xf0] }
  0x67   : > { %1050 = vmatpush.bf16.msrb.mxu2 %v1648_v19  ;;  %v1356_v19 = vor.u32 %v1798_v11, %v1353_v13  ;;  %v1705_v2 = vld [vmem:[%s2098_s23 + $0x378] sm:$0xf0]  ;;  %v1852_v13 = vld [vmem:[%s2098_s23 + $0x264] sm:$0xf]  ;;  %v1553_v40 = vld [vmem:[%s2098_s23 + $0x248] sm:$0xf0] }
  0x68   : > { %1063 = vmatpush.bf16.msrb.mxu3 %v1712_v26  ;;  %1025 = vmatmul.bf16.vlgmr.msrb.gmra.mxu0 %v2274_v41  ;;  %v1484_v26 = vor.u32 %v1830_v16, %v1481_v17  ;;  %v1633_v17 = vld [vmem:[%s2098_s23 + $0x2e8] sm:$0xf0]  ;;  %v1572_v24 = vor.u32 %v1852_v13, %v1569_v14  ;;  %v1753_v35 = vld [vmem:[%s2098_s23 + $0x3d8] sm:$0xf0]  ;;  %v1862_v53 = vld [vmem:[%s2098_s23 + $0x2b4] sm:$0xf] }
  0x69   : > { %1069 = vmatpush.bf16.msra.mxu0 %v1324_v27  ;;  %1038 = vmatmul.bf16.vlgmr.msrb.gmra.mxu1 %v2278_v44  ;;  %v1345_v27 = vld [vmem:[%s2098_s23 + $0xa8] sm:$0xf0]  ;;  %v1842_v13 = vld [vmem:[%s2098_s23 + $0x214] sm:$0xf]  ;;  %v1529_v14 = vld [vmem:[%s2098_s23 + $0x218] sm:$0xf0] }
  0x6a   : > { %1082 = vmatpush.bf16.msra.mxu1 %v1388_v29  ;;  %1051 = vmatmul.bf16.vlgmr.msrb.gmra.mxu2 %v2270_v38  ;;  %v1409_v29 = vld [vmem:[%s2098_s23 + $0x128] sm:$0xf0]  ;;  %v1348_v33 = vor.u32 %v1796_v25, %v1345_v27  ;;  %v1636_v25 = vor.u32 %v1868_v15, %v1633_v17  ;;  %v1850_v27 = vld [vmem:[%s2098_s23 + $0x254] sm:$0xf]  ;;  %v1593_v17 = vld [vmem:[%s2098_s23 + $0x298] sm:$0xf0] }
  0x6b   : > { %1095 = vmatpush.bf16.msra.mxu2 %v1452_v30  ;;  %1064 = vmatmul.bf16.vlgmr.msrb.gmra.mxu3 %v2276_v42  ;;  %v1828_v30 = vld [vmem:[%s2098_s23 + $0x1a4] sm:$0xf]  ;;  %v1858_v15 = vld [vmem:[%s2098_s23 + $0x294] sm:$0xf] }
  0x6c   : > { %1108 = vmatpush.bf16.msra.mxu3 %v1516_v34  ;;  %v1412_v34 = vor.u32 %v1812_v28, %v1409_v29  ;;  %v1476_v39 = vor.u32 %v1828_v30, %v1473_v31  ;;  %v1561_v28 = vld [vmem:[%s2098_s23 + $0x258] sm:$0xf0]  ;;  %v1866_v29 = vld [vmem:[%s2098_s23 + $0x2d4] sm:$0xf] }
  0x6d   : > { %1070 = vmatpush.bf16.msra.mxu0 %v1316_v43  ;;  %v1810_v43 = vld [vmem:[%s2098_s23 + $0x114] sm:$0xf]  ;;  %v1625_v31 = vld [vmem:[%s2098_s23 + $0x2d8] sm:$0xf0]  ;;  %v1564_v36 = vor.u32 %v1850_v27, %v1561_v28  ;;  %v1840_v27 = vld [vmem:[%s2098_s23 + $0x204] sm:$0xf] }
  0x6e   : > { %1083 = vmatpush.bf16.msra.mxu1 %v1380_v45  ;;  %v1401_v45 = vld [vmem:[%s2098_s23 + $0x118] sm:$0xf0]  ;;  %v1521_v28 = vld [vmem:[%s2098_s23 + $0x208] sm:$0xf0] }
  0x6f   : > { %1096 = vmatpush.bf16.msra.mxu2 %v1444_v46  ;;  %v1826_v46 = vld [vmem:[%s2098_s23 + $0x194] sm:$0xf]  ;;  %v1404_v52 = vor.u32 %v1810_v43, %v1401_v45  ;;  %v1864_v43 = vld [vmem:[%s2098_s23 + $0x2c4] sm:$0xf]  ;;  %v1617_v45 = vld [vmem:[%s2098_s23 + $0x2c8] sm:$0xf0] }
  0x70   : > { %1109 = vmatpush.bf16.msra.mxu3 %v1508_v50  ;;  %v1265_v50 = vld [vmem:[%s2098_s23 + $0x8] sm:$0xf0] }
  0x71   : > { %1071 = vmatpush.bf16.msra.mxu0 %v1308_v56  ;;  %v1468_v56 = vor.u32 %v1826_v46, %v1465_v47  ;;  %v1268_v63 = vor.u32 %v1776_v49, %v1265_v50  ;;  %v1681_v46 = vld [vmem:[%s2098_s23 + $0x348] sm:$0xf0]  ;;  %v1896_v47 = vld [vmem:[%s2098_s23 + $0x3c4] sm:$0xf]  ;;  %v1620_v49 = vor.u32 %v1864_v43, %v1617_v45 }
  0x72   : > { %1084 = vmatpush.bf16.msra.mxu1 %v1372_v57  ;;  %v1393_v57 = vld [vmem:[%s2098_s23 + $0x108] sm:$0xf0] }
  0x73   : > { %1097 = vmatpush.bf16.msra.mxu2 %v1436_v58  ;;  %v1824_v58 = vld [vmem:[%s2098_s23 + $0x184] sm:$0xf] }
  0x74   : > { %1110 = vmatpush.bf16.msra.mxu3 %v1500_v62  ;;  %v1870_v62 = vld [vmem:[%s2098_s23 + $0x2f4] sm:$0xf]  ;;  %v1460_v9 = vor.u32 %v1824_v58, %v1457_v59  ;;  %v1737_v59 = vld [vmem:[%s2098_s23 + $0x3b8] sm:$0xf0] }
  0x75   : > { %1072 = vmatpush.bf16.msra.mxu0 %v1300_v5  ;;  %v1396_v5 = vor.u32 %v1808_v55, %v1393_v57  ;;  %v1644_v11 = vor.u32 %v1870_v62, %v1641_v0  ;;  %v1609_v55 = vld [vmem:[%s2098_s23 + $0x2b8] sm:$0xf0]  ;;  %v1894_v58 = vld [vmem:[%s2098_s23 + $0x3b4] sm:$0xf]  ;;  %v1537_v0 = vld [vmem:[%s2098_s23 + $0x228] sm:$0xf0] }
  0x76   : > { %1085 = vmatpush.bf16.msra.mxu1 %v1364_v7  ;;  %v1902_v7 = vld [vmem:[%s2098_s23 + $0x3f4] sm:$0xf]  ;;  %v1673_v57 = vld [vmem:[%s2098_s23 + $0x338] sm:$0xf0]  ;;  %v1612_v61 = vor.u32 %v1862_v53, %v1609_v55 }
  0x77   : > { %1098 = vmatpush.bf16.msra.mxu2 %v1428_v8  ;;  %v1769_v8 = vld [vmem:[%s2098_s23 + $0x3f8] sm:$0xf0] }
  0x78   : > { %1111 = vmatpush.bf16.msra.mxu3 %v1492_v12  ;;  %v1708_v12 = vor.u32 %v1886_v1, %v1705_v2  ;;  %v1772_v16 = vor.u32 %v1902_v7, %v1769_v8  ;;  %v1860_v1 = vld [vmem:[%s2098_s23 + $0x2a4] sm:$0xf]  ;;  %v1740_v2 = vor.u32 %v1894_v58, %v1737_v59  ;;  %v1665_v7 = vld [vmem:[%s2098_s23 + $0x328] sm:$0xf0] }
  0x79   : > { %1073 = vmatpush.bf16.msra.mxu0 %v1292_v18  ;;  %v1884_v18 = vld [vmem:[%s2098_s23 + $0x364] sm:$0xf] }
  0x7a   : > { %1086 = vmatpush.bf16.msra.mxu1 %v1356_v19  ;;  %v1697_v19 = vld [vmem:[%s2098_s23 + $0x368] sm:$0xf0]  ;;  %v1892_v8 = vld [vmem:[%s2098_s23 + $0x3a4] sm:$0xf] }
  0x7b   : > { %1099 = vmatpush.bf16.msra.mxu2 %v1420_v22  ;;  %v1900_v22 = vld [vmem:[%s2098_s23 + $0x3e4] sm:$0xf] }
  0x7c   : > { %1112 = vmatpush.bf16.msra.mxu3 %v1484_v26  ;;  %v1700_v26 = vor.u32 %v1884_v18, %v1697_v19  ;;  %v1764_v30 = vor.u32 %v1900_v22, %v1761_v23  ;;  %v1874_v18 = vld [vmem:[%s2098_s23 + $0x314] sm:$0xf]  ;;  %v1657_v19 = vld [vmem:[%s2098_s23 + $0x318] sm:$0xf0] }
  0x7d   : > { %1074 = vmatpush.bf16.msra.mxu0 %v1284_v32  ;;  %v1882_v32 = vld [vmem:[%s2098_s23 + $0x354] sm:$0xf]  ;;  %v1721_v23 = vld [vmem:[%s2098_s23 + $0x398] sm:$0xf0] }
  0x7e   : > { %1087 = vmatpush.bf16.msra.mxu1 %v1348_v33  ;;  %v1689_v33 = vld [vmem:[%s2098_s23 + $0x358] sm:$0xf0]  ;;  %v1890_v22 = vld [vmem:[%s2098_s23 + $0x394] sm:$0xf] }
  0x7f   : > { %1100 = vmatpush.bf16.msra.mxu2 %v1412_v34  ;;  %v1898_v34 = vld [vmem:[%s2098_s23 + $0x3d4] sm:$0xf]  ;;  %v1692_v37 = vor.u32 %v1882_v32, %v1689_v33  ;;  %v1872_v32 = vld [vmem:[%s2098_s23 + $0x304] sm:$0xf]  ;;  %v1649_v33 = vld [vmem:[%s2098_s23 + $0x308] sm:$0xf0] }
  0x80   : > { %1113 = vmatpush.bf16.msra.mxu3 %v1476_v39  ;;  %v1848_v39 = vld [vmem:[%s2098_s23 + $0x244] sm:$0xf] }
  0x81   : > { %1075 = vmatpush.bf16.msra.mxu0 %v1276_v48  ;;  %v1556_v48 = vor.u32 %v1848_v39, %v1553_v40 }
  0x82   : > { %1088 = vmatpush.bf16.msra.mxu1 %v1340_v51  ;;  %v1846_v51 = vld [vmem:[%s2098_s23 + $0x234] sm:$0xf] }
  0x83   : > { %1101 = vmatpush.bf16.msra.mxu2 %v1404_v52  ;;  %v1545_v52 = vld [vmem:[%s2098_s23 + $0x238] sm:$0xf0] }
  0x84   : > { %1114 = vmatpush.bf16.msra.mxu3 %v1468_v56  ;;  %v1878_v56 = vld [vmem:[%s2098_s23 + $0x334] sm:$0xf]  ;;  %v1548_v60 = vor.u32 %v1846_v51, %v1545_v52 }
  0x85   : > { %1076 = vmatpush.bf16.msra.mxu0 %v1268_v63  ;;  %v1676_v62 = vor.u32 %v1878_v56, %v1673_v57  ;;  %v1844_v63 = vld [vmem:[%s2098_s23 + $0x224] sm:$0xf] }
  0x86   : > { %1089 = vmatpush.bf16.msra.mxu1 %v1332_v3  ;;  %v1601_v3 = vld [vmem:[%s2098_s23 + $0x2a8] sm:$0xf0] }
  0x87   : > { %1102 = vmatpush.bf16.msra.mxu2 %v1396_v5  ;;  %v1876_v5 = vld [vmem:[%s2098_s23 + $0x324] sm:$0xf] }
  0x88   : > { %1115 = vmatpush.bf16.msra.mxu3 %v1460_v9  ;;  %1077 = vmatmul.bf16.vlgmr.msra.gmra.mxu0 %v2211_v20  ;;  %v1756_v20 = vor.u32 %v1898_v34, %v1753_v35  ;;  %v1729_v9 = vld [vmem:[%s2098_s23 + $0x3a8] sm:$0xf0]  ;;  %v1888_v34 = vld [vmem:[%s2098_s23 + $0x384] sm:$0xf] }
  0x89   : > { %1121 = vmatpush.bf16.msrb.mxu0 %v1580_v10  ;;  %1090 = vmatmul.bf16.vlgmr.msra.gmra.mxu1 %v2214_v21  ;;  %v1745_v21 = vld [vmem:[%s2098_s23 + $0x3c8] sm:$0xf0]  ;;  %v1540_v10 = vor.u32 %v1844_v63, %v1537_v0 }
  0x8a   : > { %1134 = vmatpush.bf16.msrb.mxu1 %v1644_v11  ;;  %1103 = vmatmul.bf16.vlgmr.msra.gmra.mxu2 %v2195_v4  ;;  %v1628_v4 = vor.u32 %v1866_v29, %v1625_v31  ;;  %v1748_v54 = vor.u32 %v1896_v47, %v1745_v21  ;;  %v1604_v11 = vor.u32 %v1860_v1, %v1601_v3  ;;  %v1856_v29 = vld [vmem:[%s2098_s23 + $0x284] sm:$0xf]  ;;  %v1585_v31 = vld [vmem:[%s2098_s23 + $0x288] sm:$0xf0] }
  0x8b   : > { %1147 = vmatpush.bf16.msrb.mxu2 %v1708_v12  ;;  %1116 = vmatmul.bf16.vlgmr.msra.gmra.mxu3 %v2200_v6  ;;  %v1880_v6 = vld [vmem:[%s2098_s23 + $0x344] sm:$0xf]  ;;  %v1668_v12 = vor.u32 %v1876_v5, %v1665_v7  ;;  %v1713_v35 = vld [vmem:[%s2098_s23 + $0x388] sm:$0xf0] }
  0x8c   : > { %1160 = vmatpush.bf16.msrb.mxu3 %v1772_v16  ;;  %v1684_v50 = vor.u32 %v1880_v6, %v1681_v46  ;;  %v1732_v16 = vor.u32 %v1892_v8, %v1729_v9  ;;  %v1716_v39 = vor.u32 %v1888_v34, %v1713_v35 }
  0x8d   : > { %1122 = vmatpush.bf16.msrb.mxu0 %v1572_v24  ;;  %v1532_v24 = vor.u32 %v1842_v13, %v1529_v14 }
  0x8e   : > { %1135 = vmatpush.bf16.msrb.mxu1 %v1636_v25  ;;  %v1596_v25 = vor.u32 %v1858_v15, %v1593_v17 }
  0x8f   : > { %1148 = vmatpush.bf16.msrb.mxu2 %v1700_v26  ;;  %v1660_v26 = vor.u32 %v1874_v18, %v1657_v19 }
  0x90   : > { %1161 = vmatpush.bf16.msrb.mxu3 %v1764_v30  ;;  %v1724_v30 = vor.u32 %v1890_v22, %v1721_v23 }
  0x91   : > { %1123 = vmatpush.bf16.msrb.mxu0 %v1564_v36  ;;  %v1524_v36 = vor.u32 %v1840_v27, %v1521_v28 }
  0x92   : > { %1136 = vmatpush.bf16.msrb.mxu1 %v1628_v4  ;;  %v1588_v4 = vor.u32 %v1856_v29, %v1585_v31 }
  0x93   : > { %1149 = vmatpush.bf16.msrb.mxu2 %v1692_v37  ;;  %v1652_v37 = vor.u32 %v1872_v32, %v1649_v33 }
  0x94   : > { %1162 = vmatpush.bf16.msrb.mxu3 %v1756_v20 }
  0x95   : > { %1124 = vmatpush.bf16.msrb.mxu0 %v1556_v48 }
  0x96   : > { %1137 = vmatpush.bf16.msrb.mxu1 %v1620_v49 }
  0x97   : > { %1150 = vmatpush.bf16.msrb.mxu2 %v1684_v50 }
  0x98   : > { %1163 = vmatpush.bf16.msrb.mxu3 %v1748_v54 }
  0x99   : > { %1125 = vmatpush.bf16.msrb.mxu0 %v1548_v60 }
  0x9a   : > { %1138 = vmatpush.bf16.msrb.mxu1 %v1612_v61 }
  0x9b   : > { %1151 = vmatpush.bf16.msrb.mxu2 %v1676_v62 }
  0x9c   : > { %1164 = vmatpush.bf16.msrb.mxu3 %v1740_v2 }
  0x9d   : > { %1126 = vmatpush.bf16.msrb.mxu0 %v1540_v10 }
  0x9e   : > { %1139 = vmatpush.bf16.msrb.mxu1 %v1604_v11 }
  0x9f   : > { %1152 = vmatpush.bf16.msrb.mxu2 %v1668_v12 }
  0xa0   : > { %1165 = vmatpush.bf16.msrb.mxu3 %v1732_v16 }
  0xa1   : > { %1127 = vmatpush.bf16.msrb.mxu0 %v1532_v24 }
  0xa2   : > { %1140 = vmatpush.bf16.msrb.mxu1 %v1596_v25 }
  0xa3   : > { %1153 = vmatpush.bf16.msrb.mxu2 %v1660_v26 }
  0xa4   : > { %1166 = vmatpush.bf16.msrb.mxu3 %v1724_v30 }
  0xa5   : > { %1128 = vmatpush.bf16.msrb.mxu0 %v1524_v36 }
  0xa6   : > { %1141 = vmatpush.bf16.msrb.mxu1 %v1588_v4 }
  0xa7   : > { %1154 = vmatpush.bf16.msrb.mxu2 %v1652_v37 }
  0xa8   : > { %1167 = vmatpush.bf16.msrb.mxu3 %v1716_v39  ;;  %1129 = vmatmul.bf16.vlgmr.msrb.gmra.mxu0 %v2274_v41 }
  0xa9   : > { %1142 = vmatmul.bf16.vlgmr.msrb.gmra.mxu1 %v2278_v44 }
  0xaa   : > { %1155 = vmatmul.bf16.vlgmr.msrb.gmra.mxu2 %v2270_v38 }
  0xab   : > { %1168 = vmatmul.bf16.vlgmr.msrb.gmra.mxu3 %v2276_v42 }
  0xc5   : > { %v974_v40 = vpop.f32.mrf.mxu0 }
  0xc6   : > { %v987_v43 = vpop.f32.mrf.mxu1 }
  0xc7   : > { %v988_v20 = vadd.f32 %v987_v43, %v974_v40 }
  0xcd   : > { %v1000_v45 = vpop.f32.mrf.mxu2  ;;  %v976_v21 = vpop.f32.mrf.mxu0 }
  0xce   : > { %v1013_v6 = vpop.f32.mrf.mxu3  ;;  %v1001_v46 = vadd.f32 %v1000_v45, %v988_v20  ;;  %v989_v48 = vpop.f32.mrf.mxu1 }
  0xd0   : > { %v1014_v47 = vadd.f32 %v1013_v6, %v1001_v46 }
  0xd5   : > { %v1002_v49 = vpop.f32.mrf.mxu2 }
  0xd6   : > { %v1015_v50 = vpop.f32.mrf.mxu3 }
  0xe5   : > { %v1026_v51 = vpop.f32.mrf.mxu0 }
  0xe6   : > { %v1039_v52 = vpop.f32.mrf.mxu1  ;;  %v1027_v0 = vadd.f32 %v1026_v51, %v1014_v47 }
  0xe8   : > { %v1040_v2 = vadd.f32 %v1039_v52, %v1027_v0 }
  0xed   : > { %v1052_v41 = vpop.f32.mrf.mxu2  ;;  %v1028_v44 = vpop.f32.mrf.mxu0 }
  0xee   : > { %v1065_v53 = vpop.f32.mrf.mxu3  ;;  %v1041_v54 = vpop.f32.mrf.mxu1  ;;  %v1053_v8 = vadd.f32 %v1052_v41, %v1040_v2 }
  0xf0   : > { %v1066_v10 = vadd.f32 %v1065_v53, %v1053_v8 }
  0xf2   : > { %v1178_v17 = vrot.slane %v1066_v10, 4 }
  0xf5   : > { %v1054_v38 = vpop.f32.mrf.mxu2 }
  0xf6   : > { %v1067_v55 = vpop.f32.mrf.mxu3 }
 0x105   : > { %v1078_v42 = vpop.f32.mrf.mxu0 }
 0x106   : > { %v1091_v56 = vpop.f32.mrf.mxu1 }
 0x107   : > { %v1092_v63 = vadd.f32 %v1091_v56, %v1078_v42 }
 0x10d   : > { %v1104_v57 = vpop.f32.mrf.mxu2  ;;  %v1080_v59 = vpop.f32.mrf.mxu0 }
 0x10e   : > { %v1117_v58 = vpop.f32.mrf.mxu3  ;;  %v1093_v60 = vpop.f32.mrf.mxu1  ;;  %v1105_v1 = vadd.f32 %v1104_v57, %v1092_v63 }
 0x110   : > { %v1118_v3 = vadd.f32 %v1117_v58, %v1105_v1 }
 0x115   : > { %v1106_v61 = vpop.f32.mrf.mxu2 }
 0x116   : > { %v1119_v62 = vpop.f32.mrf.mxu3 }
 0x125   : > { %v1130_v5 = vpop.f32.mrf.mxu0 }
 0x126   : > { %v1143_v7 = vpop.f32.mrf.mxu1  ;;  %v1131_v9 = vadd.f32 %v1130_v5, %v1118_v3 }
 0x128   : > { %v1144_v11 = vadd.f32 %v1143_v7, %v1131_v9 }
 0x12d   : > { %v1156_v12 = vpop.f32.mrf.mxu2  ;;  %v1132_v15 = vpop.f32.mrf.mxu0 }
 0x12e   : > { %v1157_v13 = vadd.f32 %v1156_v12, %v1144_v11  ;;  %v1169_v14 = vpop.f32.mrf.mxu3  ;;  %v1145_v16 = vpop.f32.mrf.mxu1 }
 0x130   : > { %v1170_v18 = vadd.f32 %v1169_v14, %v1157_v13 }
 0x132   : > { %v1174_v19 = vrot.slane %v1170_v18, 4  ;;  %v1180_v22 = vadd.f32 %v1178_v17, %v1170_v18 }
 0x134   : > { %v1176_v23 = vsub.f32 %v1066_v10, %v1174_v19  ;;  %v1182_v24 = vrot.slane %v1180_v22, 4 }
 0x135   : > { %v1158_v25 = vpop.f32.mrf.mxu2 }
 0x136   : > { %v1185_v26 = vsel %vm1184_vm0, %v1176_v23, %v1182_v24  ;;  %v1171_v27 = vpop.f32.mrf.mxu3 }
 0x137   : > { %1186 = vst [vmem:[%s164_s5] sm:$0xff] %v1185_v26 }
 0x138 PF: > { %p12_p7 = scmp.ge.s32.totalorder %s2052_s14, 10   ;;  %s2428_s9 = smov %s2002_s10 }
 0x139   : > { %s2429_s10 = smov %s2006_s11  ;;  %s2430_s11 = smov %s2062_s17 }
 0x13a   : > { %s2431_s12 = smov %s2052_s14  ;;  %14 = sbr.rel (!%p12_p7) target bundleno = 3 (0x3), region = 68 }
 0x13f   :  { %1206 = vsyncpa [#allocation3], 1 }
 0x140   :  { %1208 = vsyncpa [#allocation3 + $0x1], 1 }

</bundles_post_ra>
